<compile_context>
chip_gen: v7x
topology: tpu7x:2x2x1
jax: 0.10.0
libtpu: 0.0.40
codegen_flags: <defaults>
</compile_context>

<pallas_src>
import jax
import jax.numpy as jnp
from jax.experimental import pallas as pl
from jax.experimental.pallas import tpu as pltpu


def _round_up(x: int, m: int) -> int:
    return ((x + m - 1) // m) * m


def mlp_kernel(x_ref, w1_ref, b1_ref, w2_ref, b2_ref, w3_ref, b3_ref, o_ref):
    # Weights are pre-transposed to [in, out]: plain x @ W on the MXU,
    # f32 accumulation, f32 bias + ReLU epilogue.
    x = x_ref[...].astype(w1_ref.dtype)

    h1 = jnp.dot(x, w1_ref[...], preferred_element_type=jnp.float32)
    h1 = jnp.maximum(h1 + b1_ref[...], 0.0)

    h2 = jnp.dot(h1.astype(w2_ref.dtype), w2_ref[...],
                 preferred_element_type=jnp.float32)
    h2 = jnp.maximum(h2 + b2_ref[...], 0.0)

    out = jnp.dot(h2.astype(w3_ref.dtype), w3_ref[...],
                  preferred_element_type=jnp.float32) + b3_ref[...]
    o_ref[...] = out.astype(o_ref.dtype)


def prepare_params(params, *, compute_dtype=jnp.bfloat16):
    """One-time parameter prep (do NOT call per forward).

    params follow the PyTorch nn.Linear convention: w{i}: [out, in], b{i}: [out].
    Weights are transposed to [in, out] and cast to `compute_dtype`; biases are
    kept in f32 (added in the f32 epilogue after f32-accumulated dots).
    """
    return {
        "w1": jnp.asarray(params["w1"]).T.astype(compute_dtype),
        "w2": jnp.asarray(params["w2"]).T.astype(compute_dtype),
        "w3": jnp.asarray(params["w3"]).T.astype(compute_dtype),
        "b1": jnp.asarray(params["b1"]).reshape(1, -1).astype(jnp.float32),
        "b2": jnp.asarray(params["b2"]).reshape(1, -1).astype(jnp.float32),
        "b3": jnp.asarray(params["b3"]).reshape(1, -1).astype(jnp.float32),
    }


def small_mlp_forward(x, prep, *, batch_tile=1024, out_dtype=None):
    """x: [B, input_size].  prep: output of prepare_params()."""
    B, in_size = x.shape
    num_classes = prep["w3"].shape[1]
    out_dtype = x.dtype if out_dtype is None else out_dtype

    # Batch tiling: smallest padding that yields multiple-of-8 tiles, with an
    # even number of tiles (when >1) so v7x's two TensorCores stay balanced.
    ntiles = max(1, pl.cdiv(B, batch_tile))
    if ntiles > 1 and ntiles % 2 == 1:
        ntiles += 1
    tb = _round_up(pl.cdiv(B, ntiles), 8)
    b_pad = ntiles * tb
    xp = x if b_pad == B else jnp.pad(x, ((0, b_pad - B), (0, 0)))

    const2 = lambda i: (0, 0)  # weights/biases: same (full) block every step

    out = pl.pallas_call(
        mlp_kernel,
        out_shape=jax.ShapeDtypeStruct((b_pad, num_classes), out_dtype),
        grid=(ntiles,),
        in_specs=[
            pl.BlockSpec((tb, in_size), lambda i: (i, 0)),  # x: tiled over batch
            pl.BlockSpec(prep["w1"].shape, const2),         # weights VMEM-resident
            pl.BlockSpec(prep["b1"].shape, const2),
            pl.BlockSpec(prep["w2"].shape, const2),
            pl.BlockSpec(prep["b2"].shape, const2),
            pl.BlockSpec(prep["w3"].shape, const2),
            pl.BlockSpec(prep["b3"].shape, const2),
        ],
        out_specs=pl.BlockSpec((tb, num_classes), lambda i: (i, 0)),
        compiler_params=pltpu.CompilerParams(
            dimension_semantics=("parallel",)),             # dual-TC on v7x
    )(xp, prep["w1"], prep["b1"], prep["w2"], prep["b2"], prep["w3"], prep["b3"])

    return out if b_pad == B else out[:B]


def reference_forward(x, params):
    h1 = jnp.maximum(x @ params["w1"].T + params["b1"], 0.0)
    h2 = jnp.maximum(h1 @ params["w2"].T + params["b2"], 0.0)
    return h2 @ params["w3"].T + params["b3"]


if __name__ == "__main__":
    # Small shapes consistent with SmallMLP(input_size, h1, h2, num_classes).
    batch, input_size, hidden1, hidden2, num_classes = 8, 64, 32, 32, 10

    key = jax.random.PRNGKey(0)
    kx, k1, k2, k3, kb1, kb2, kb3 = jax.random.split(key, 7)

    x = jax.random.normal(kx, (batch, input_size), dtype=jnp.float32)

    # Deterministic synthetic parameters (PyTorch nn.Linear shapes: [out, in]).
    params = {
        "w1": jax.random.normal(k1, (hidden1, input_size), jnp.float32) * 0.1,
        "b1": jax.random.normal(kb1, (hidden1,), jnp.float32) * 0.1,
        "w2": jax.random.normal(k2, (hidden2, hidden1), jnp.float32) * 0.1,
        "b2": jax.random.normal(kb2, (hidden2,), jnp.float32) * 0.1,
        "w3": jax.random.normal(k3, (num_classes, hidden2), jnp.float32) * 0.1,
        "b3": jax.random.normal(kb3, (num_classes,), jnp.float32) * 0.1,
    }

    ref = reference_forward(x, params)

    # One-time parameter prep (default bf16 operands, f32 accumulation).
    prep_bf16 = prepare_params(params)                              # fast path
    prep_f32 = prepare_params(params, compute_dtype=jnp.float32)    # exact path

    # 1) f32 path: exact semantics of the PyTorch module.
    out_f32 = jax.block_until_ready(small_mlp_forward(x, prep_f32))
    assert out_f32.shape == (batch, num_classes), out_f32.shape
    assert jnp.allclose(out_f32, ref, atol=1e-5, rtol=1e-5), \
        f"f32 max abs err {jnp.max(jnp.abs(out_f32 - ref))}"

    # 2) Default bf16-operand path (MXU fast path), f32 accumulation.
    out_bf16 = jax.block_until_ready(small_mlp_forward(x, prep_bf16))
    assert out_bf16.shape == (batch, num_classes)
    assert jnp.allclose(out_bf16, ref, atol=5e-2, rtol=5e-2), \
        f"bf16 max abs err {jnp.max(jnp.abs(out_bf16 - ref))}"

    # 3) Non-multiple-of-8 batch with grid > 1 (exercises padding + even tiling).
    xb = jax.random.normal(kx, (300, input_size), dtype=jnp.float32)
    ref_big = reference_forward(xb, params)
    out_big = jax.block_until_ready(
        small_mlp_forward(xb, prep_f32, batch_tile=128))   # -> 4 tiles of 80 rows
    assert out_big.shape == (300, num_classes)
    assert jnp.allclose(out_big, ref_big, atol=1e-5, rtol=1e-5), \
        f"tiled f32 max abs err {jnp.max(jnp.abs(out_big - ref_big))}"

    # 4) Same batch through the default (single-tile, bf16) path.
    out_big_bf16 = jax.block_until_ready(small_mlp_forward(xb, prep_bf16))
    assert out_big_bf16.shape == (300, num_classes)
    assert jnp.allclose(out_big_bf16, ref_big, atol=5e-2, rtol=5e-2), \
        f"tiled bf16 max abs err {jnp.max(jnp.abs(out_big_bf16 - ref_big))}"

    print("KERNEL_OK")
</pallas_src>

<mosaic_0001>
module attributes {stable_mosaic.version = 11 : i64} {
  func.func @mlp_kernel(%arg0: i32, %arg1: memref<8x64xf32, #tpu.memory_space<vmem>>, %arg2: memref<64x32xf32, #tpu.memory_space<vmem>>, %arg3: memref<1x32xf32, #tpu.memory_space<vmem>>, %arg4: memref<32x32xf32, #tpu.memory_space<vmem>>, %arg5: memref<1x32xf32, #tpu.memory_space<vmem>>, %arg6: memref<32x10xf32, #tpu.memory_space<vmem>>, %arg7: memref<1x10xf32, #tpu.memory_space<vmem>>, %arg8: memref<8x10xf32, #tpu.memory_space<vmem>>) attributes {dimension_semantics = [#tpu.dimension_semantics<parallel>], iteration_bounds = array<i64: 1>, scalar_prefetch = 0 : i64, scratch_operands = 0 : i64, tpu.core_type = #tpu.core_type<tc>, window_params = [{transform_indices = @transform_0, window_bounds = array<i64: 8, 64>}, {pipeline_mode = #tpu.pipeline_mode<synchronous>, transform_indices = @transform_1, window_bounds = array<i64: 64, 32>}, {pipeline_mode = #tpu.pipeline_mode<synchronous>, transform_indices = @transform_2, window_bounds = array<i64: 1, 32>}, {pipeline_mode = #tpu.pipeline_mode<synchronous>, transform_indices = @transform_3, window_bounds = array<i64: 32, 32>}, {pipeline_mode = #tpu.pipeline_mode<synchronous>, transform_indices = @transform_4, window_bounds = array<i64: 1, 32>}, {pipeline_mode = #tpu.pipeline_mode<synchronous>, transform_indices = @transform_5, window_bounds = array<i64: 32, 10>}, {pipeline_mode = #tpu.pipeline_mode<synchronous>, transform_indices = @transform_6, window_bounds = array<i64: 1, 10>}, {transform_indices = @transform_7, window_bounds = array<i64: 8, 10>}]} {
    %c0 = arith.constant 0 : index
    %c0_0 = arith.constant 0 : index
    %0 = vector.load %arg1[%c0, %c0_0] : memref<8x64xf32, #tpu.memory_space<vmem>>, vector<8x64xf32>
    %c0_1 = arith.constant 0 : index
    %c0_2 = arith.constant 0 : index
    %1 = vector.load %arg2[%c0_1, %c0_2] : memref<64x32xf32, #tpu.memory_space<vmem>>, vector<64x32xf32>
    %cst = arith.constant dense<0.000000e+00> : vector<8x32xf32>
    %2 = tpu.matmul %0, %1, %cst {dimension_numbers = #tpu.dot_dimension_numbers<[1], [0], [0], [1], [0, 0, 1, 1], [], []>} : vector<8x64xf32>, vector<64x32xf32>, vector<8x32xf32> -> vector<8x32xf32>
    %c0_3 = arith.constant 0 : index
    %c0_4 = arith.constant 0 : index
    %3 = vector.load %arg3[%c0_3, %c0_4] : memref<1x32xf32, #tpu.memory_space<vmem>>, vector<1x32xf32>
    %4 = vector.broadcast %3 : vector<1x32xf32> to vector<8x32xf32>
    %5 = arith.addf %2, %4 : vector<8x32xf32>
    %cst_5 = arith.constant 0.000000e+00 : f32
    %6 = vector.broadcast %cst_5 : f32 to vector<8x32xf32>
    %7 = arith.maximumf %5, %6 : vector<8x32xf32>
    %c0_6 = arith.constant 0 : index
    %c0_7 = arith.constant 0 : index
    %8 = vector.load %arg4[%c0_6, %c0_7] : memref<32x32xf32, #tpu.memory_space<vmem>>, vector<32x32xf32>
    %cst_8 = arith.constant dense<0.000000e+00> : vector<8x32xf32>
    %9 = tpu.matmul %7, %8, %cst_8 {dimension_numbers = #tpu.dot_dimension_numbers<[1], [0], [0], [1], [0, 0, 1, 1], [], []>} : vector<8x32xf32>, vector<32x32xf32>, vector<8x32xf32> -> vector<8x32xf32>
    %c0_9 = arith.constant 0 : index
    %c0_10 = arith.constant 0 : index
    %10 = vector.load %arg5[%c0_9, %c0_10] : memref<1x32xf32, #tpu.memory_space<vmem>>, vector<1x32xf32>
    %11 = vector.broadcast %10 : vector<1x32xf32> to vector<8x32xf32>
    %12 = arith.addf %9, %11 : vector<8x32xf32>
    %cst_11 = arith.constant 0.000000e+00 : f32
    %13 = vector.broadcast %cst_11 : f32 to vector<8x32xf32>
    %14 = arith.maximumf %12, %13 : vector<8x32xf32>
    %c0_12 = arith.constant 0 : index
    %c0_13 = arith.constant 0 : index
    %15 = vector.load %arg6[%c0_12, %c0_13] : memref<32x10xf32, #tpu.memory_space<vmem>>, vector<32x10xf32>
    %cst_14 = arith.constant dense<0.000000e+00> : vector<8x10xf32>
    %16 = tpu.matmul %14, %15, %cst_14 {dimension_numbers = #tpu.dot_dimension_numbers<[1], [0], [0], [1], [0, 0, 1, 1], [], []>} : vector<8x32xf32>, vector<32x10xf32>, vector<8x10xf32> -> vector<8x10xf32>
    %c0_15 = arith.constant 0 : index
    %c0_16 = arith.constant 0 : index
    %17 = vector.load %arg7[%c0_15, %c0_16] : memref<1x10xf32, #tpu.memory_space<vmem>>, vector<1x10xf32>
    %18 = vector.broadcast %17 : vector<1x10xf32> to vector<8x10xf32>
    %19 = arith.addf %16, %18 : vector<8x10xf32>
    %c0_17 = arith.constant 0 : index
    %c0_18 = arith.constant 0 : index
    %20 = vector.load %arg8[%c0_17, %c0_18] : memref<8x10xf32, #tpu.memory_space<vmem>>, vector<8x10xf32>
    tpu.vector_store %arg8[%c0_17, %c0_18], %19 {strides = array<i32>} : memref<8x10xf32, #tpu.memory_space<vmem>>, vector<8x10xf32>,
    return
  }
  func.func @transform_0(%arg0: i32) -> (i32, i32) {
    %c0_i32 = arith.constant 0 : i32
    %c0_i32_0 = arith.constant 0 : i32
    return %arg0, %c0_i32 : i32, i32
  }
  func.func @transform_1(%arg0: i32) -> (i32, i32) {
    %c0_i32 = arith.constant 0 : i32
    %c0_i32_0 = arith.constant 0 : i32
    %c0_i32_1 = arith.constant 0 : i32
    return %c0_i32, %c0_i32_0 : i32, i32
  }
  func.func @transform_2(%arg0: i32) -> (i32, i32) {
    %c0_i32 = arith.constant 0 : i32
    %c0_i32_0 = arith.constant 0 : i32
    %c0_i32_1 = arith.constant 0 : i32
    return %c0_i32, %c0_i32_0 : i32, i32
  }
  func.func @transform_3(%arg0: i32) -> (i32, i32) {
    %c0_i32 = arith.constant 0 : i32
    %c0_i32_0 = arith.constant 0 : i32
    %c0_i32_1 = arith.constant 0 : i32
    return %c0_i32, %c0_i32_0 : i32, i32
  }
  func.func @transform_4(%arg0: i32) -> (i32, i32) {
    %c0_i32 = arith.constant 0 : i32
    %c0_i32_0 = arith.constant 0 : i32
    %c0_i32_1 = arith.constant 0 : i32
    return %c0_i32, %c0_i32_0 : i32, i32
  }
  func.func @transform_5(%arg0: i32) -> (i32, i32) {
    %c0_i32 = arith.constant 0 : i32
    %c0_i32_0 = arith.constant 0 : i32
    %c0_i32_1 = arith.constant 0 : i32
    return %c0_i32, %c0_i32_0 : i32, i32
  }
  func.func @transform_6(%arg0: i32) -> (i32, i32) {
    %c0_i32 = arith.constant 0 : i32
    %c0_i32_0 = arith.constant 0 : i32
    %c0_i32_1 = arith.constant 0 : i32
    return %c0_i32, %c0_i32_0 : i32, i32
  }
  func.func @transform_7(%arg0: i32) -> (i32, i32) {
    %c0_i32 = arith.constant 0 : i32
    %c0_i32_0 = arith.constant 0 : i32
    return %arg0, %c0_i32 : i32, i32
  }
}

</mosaic_0001>

<bundles_post_ra>
// kernel: tpu_custom_call.1
= control target key start
LH: loop header
LB: loop body
LE: loop exit
PB: predicated region body
PF: predicated region fallthrough
CT: control target
= control target key end

     0   :  { %v422_v3 = vmov 0.0|0.0   ;;  %vm423_vm0 = vmmov 0   ;;  %v424_v6 = vmov 0.0   ;;  %s543_s0 = inlined_call_operand.vmem [shape: f32[8,64], index: 0, kind: input, shape index: {}]   ;;  %s544_s1 = inlined_call_operand.vmem [shape: f32[64,32], index: 1, kind: input, shape index: {}]   ;;  %s545_s2 = inlined_call_operand.vmem [shape: f32[1,32], index: 2, kind: input, shape index: {}]   ;;  %s546_s3 = inlined_call_operand.vmem [shape: f32[32,32], index: 3, kind: input, shape index: {}]   ;;  %s547_s4 = inlined_call_operand.vmem [shape: f32[1,32], index: 4, kind: input, shape index: {}]   ;;  %s548_s5 = inlined_call_operand.vmem [shape: f32[32,10], index: 5, kind: input, shape index: {}]   ;;  %s549_s6 = inlined_call_operand.vmem [shape: f32[1,10], index: 6, kind: input, shape index: {}]   ;;  %s550_s7 = inlined_call_operand.hbm [shape: f32[8,10], index: 7, kind: output, shape index: {}]  }
   0x1   :  { %v28_v0 = vld [vmem:[%s544_s1] sm:$0xff]  ;;  %v29_v1 = vld [vmem:[%s544_s1 + $0x8] sm:$0xff]  ;;  %v30_v2 = vld [vmem:[%s544_s1 + $0x10] sm:$0xff]  ;;  %370 = vmatprep.subr.bf16.mxu0 %v422_v3  ;;  %345 = vmatprep.mubr.msk.f32.mxu0 %vm423_vm0, %v424_v6 }
   0x2   :  { %v371_v4 = vpack.c.bf16 %v29_v1, %v28_v0  ;;  %v31_v5 = vld [vmem:[%s544_s1 + $0x18] sm:$0xff]  ;;  %382 = vmatprep.subr.bf16.mxu1 %v422_v3  ;;  %356 = vmatprep.mubr.msk.f32.mxu1 %vm423_vm0, %v424_v6  ;;  %v118_v8 = vld [vmem:[%s546_s3] sm:$0xff]  ;;  %v119_v9 = vld [vmem:[%s546_s3 + $0x8] sm:$0xff] }
   0x3   :  { %v374_v7 = vpack.c.bf16 %v31_v5, %v30_v2  ;;  %v32_v10 = vld [vmem:[%s544_s1 + $0x20] sm:$0xff]  ;;  %v33_v11 = vld [vmem:[%s544_s1 + $0x28] sm:$0xff]  ;;  %v383_v12 = vpack.c.bf16 %v119_v9, %v118_v8 }
   0x4   :  { %372 = vmatpush3.bf16.msra.mxu0 %v371_v4 }
   0x5   :  { %373 = vmatprep.subr.bf16.mxu0 %v422_v3 }
   0x6   :  { %12 = vsyncpa [#allocation3], 0  ;;  %384 = vmatpush3.bf16.msra.mxu1 %v383_v12  ;;  %v377_v13 = vpack.c.bf16 %v33_v11, %v32_v10  ;;  %v34_v14 = vld [vmem:[%s544_s1 + $0x30] sm:$0xff]  ;;  %v35_v15 = vld [vmem:[%s544_s1 + $0x38] sm:$0xff]  ;;  %vm43_vm1 = vcmask 523264   ;;  %vm129_vm2 = vcmask 261120  }
   0x7   :  { %385 = vmatprep.subr.bf16.mxu1 %v422_v3  ;;  %v380_v16 = vpack.c.bf16 %v35_v15, %v34_v14  ;;  %v27_v17 = vld [vmem:[%s543_s0] sm:$0xff]  ;;  %v120_v18 = vld [vmem:[%s546_s3 + $0x10] sm:$0xff]  ;;  %v121_v19 = vld [vmem:[%s546_s3 + $0x18] sm:$0xff]  ;;  %s425_s14 = smov [#allocation2]   ;;  %vm288_vm3 = vcmask 80896  }
   0x8   :  { %375 = vmatpush3.bf16.msra.mxu0 %v374_v7  ;;  %v386_v20 = vpack.c.bf16 %v121_v19, %v120_v18  ;;  %v304_v21 = vld [vmem:[%s545_s2] ss:$0 sm:$0xff]  ;;  %v205_v23 = vld [vmem:[%s548_s5 + $0x8] sm:$0xff]  ;;  %v206_v29 = vld [vmem:[%s548_s5 + $0x10] sm:$0xff]  ;;  %s296_s15 = sshll.u32 %s425_s14, 4  ;;  %s297_s15 = int_to_ptr.vmem [resolvable:$true] %s296_s15 }
   0x9   :  { %376 = vmatprep.subr.bf16.mxu0 %v422_v3  ;;  %v204_v22 = vld [vmem:[%s548_s5] sm:$0xff]  ;;  %v207_v30 = vld [vmem:[%s548_s5 + $0x18] sm:$0xff]  ;;  %s398_s5 = scalar_lea.vmem %s297_s15, 128  ;;  %p403_p1 = scmp.lt.s32.totalorder %s297_s15, %s297_s15 }
   0xa   :  { %387 = vmatpush3.bf16.msra.mxu1 %v386_v20  ;;  %v389_v27 = vpack.c.bf16 %v205_v23, %v204_v22  ;;  %v392_v31 = vpack.c.bf16 %v207_v30, %v206_v29  ;;  %v306_v32 = vld [vmem:[%s547_s4] ss:$0 sm:$0xff]  ;;  %p399_p0 = scmp.ne.s32.totalorder %s297_s15, %s398_s5  ;;  %p404_p2 = scmp.lt.s32.totalorder %s398_s5, %s398_s5 }
   0xb   :  { %388 = vmatprep.subr.bf16.mxu1 %v422_v3  ;;  %v308_v37 = vld [vmem:[%s549_s6] ss:$0 sm:$0xff] }
   0xc   :  { %378 = vmatpush3.bf16.msra.mxu0 %v377_v13  ;;  %p405_p3 = por %p404_p2, %p403_p1 }
   0xd   :  { %379 = vmatprep.subr.bf16.mxu0 %v422_v3 }
   0xe   :  { %p406_p4 = pnand %p405_p3, %p399_p0 }
  0x10   :  { %381 = vmatpush3.bf16.msra.mxu0 %v380_v16 }
  0x13   :  { %346 = vmatmul.mubr.msk.f32.vlgmr.msra.gmra.mrb[0].mxu0 %vm43_vm1, %v27_v17 }
  0xe6   :  { %v113_v24 = vpop.f32.mrb[0].mxu0 }
  0xe7   :  { %v114_v25 = vadd.f32 %v304_v21, %v113_v24  ;;  %v347_v26 = vpop.f32.mrb[1].mxu0 }
  0xe9   :  { %v117_v28 = vmax.f32 %v114_v25, 0.0 }
  0xeb   :  { %357 = vmatmul.mubr.msk.f32.vlgmr.msra.gmra.mrb[0].mxu1 %vm129_vm2, %v117_v28 }
  0xec   :  { %390 = vmatpush3.bf16.msra.mxu1 %v389_v27  ;;  %367 = vmatprep.mubr.msk.f32.mxu1 %vm423_vm0, %v424_v6 }
  0xed   :  { %391 = vmatprep.subr.bf16.mxu1 %v422_v3 }
  0xf0   :  { %393 = vmatpush3.bf16.msra.mxu1 %v392_v31 }
 0x1be   :  { %v199_v33 = vpop.f32.mrb[0].mxu1 }
 0x1bf   :  { %v200_v34 = vadd.f32 %v306_v32, %v199_v33  ;;  %v358_v35 = vpop.f32.mrb[1].mxu1 }
 0x1c1   :  { %v203_v36 = vmax.f32 %v200_v34, 0.0 }
 0x1c3   :  { %368 = vmatmul.mubr.msk.f32.vlgmr.msra.gmra.mrb[2].mxu1 %vm129_vm2, %v203_v36 }
 0x296   :  { %v284_v38 = vpop.f32.mrb[2].mxu1 }
 0x297   :  { %v285_v39 = vadd.f32 %v308_v37, %v284_v38  ;;  %v369_v40 = vpop.f32.mrb[3].mxu1 }
 0x299   :  { %289 = vst.msk [vmem:[#allocation2] sm:$0xff] %vm288_vm3, %v285_v39 }
 0x29a   :  { %409 = shalt.err (!%p406_p4)
}
 0x29b   :  { %s410_s17 = scalar_lea.hbm %s550_s7, 128 }
 0x29c   :  { %p411_p5 = scmp.ne.s32.totalorder %s550_s7, %s410_s17  ;;  %p414_p6 = scmp.lt.u32.totalorder %s410_s17, %s550_s7 }
 0x29e   :  { %p416_p7 = pnand %p414_p6, %p411_p5 }
 0x2a0   :  { %419 = shalt.err (!%p416_p7)
}
 0x2a1   :  { %299 = dma.vmem_to_hbm [thread:$0]  %s297_s15, 128, %s550_s7, [#allocation3]  }
 0x2a2   :  { %420 = dma.done.wait [#allocation3], 128  }
 0x2a3   :  { %421 = vsyncadd [#allocation3], 4294967168 }
 0x2a4   :  { %303 = vsyncpa [#allocation3], 1 }

</bundles_post_ra>
